<compile_context>
chip_gen: v5e
topology: v5e:2x2
jax: 0.10.0
libtpu: 0.0.40
codegen_flags: <defaults>
</compile_context>

<pallas_src>
import jax
import jax.numpy as jnp
from jax.experimental import pallas as pl
from jax.experimental.pallas import tpu as pltpu


def morality_coach_kernel(x_ref, w1_ref, b1_ref, w2_ref, b2_ref, o_ref):
    # fc1, transposed: W1 (H, D_in) contracted with x (TM, D_in) over D_in
    # -> hT (H, TM), batch on the lane axis.  f32 MXU at HIGHEST precision to
    # match the f32 PyTorch Linear.
    hT = jax.lax.dot_general(
        w1_ref[...], x_ref[...],
        dimension_numbers=(((1,), (1,)), ((), ())),
        preferred_element_type=jnp.float32,
        precision=jax.lax.Precision.HIGHEST,
    )
    hT = jnp.maximum(hT + b1_ref[...], 0.0)  # b1: (H, 1), broadcast over lanes
    # fc2 (out_features == 1): VPU multiply by the (H, 1) weight column and a
    # sublane reduction -> (1, TM) lane-dense row; b2 is a scalar in SMEM.
    out = jnp.sum(hT * w2_ref[...], axis=0, keepdims=True) + b2_ref[0, 0]
    o_ref[...] = out[None].astype(o_ref.dtype)


def morality_coach_forward(x, w1, b1, w2, b2, *, block_batch=8192):
    """MoralityCoach forward.

    x:  (B, D_in) f32
    w1: (H, D_in) f32  (PyTorch fc1.weight layout)
    b1: (H, 1)    f32  (fc1.bias as a column)
    w2: (H, 1)    f32  (fc2.weight transposed to a column)
    b2: (1, 1)    f32  (fc2.bias)
    Returns (B, 1) f32 == relu(x @ w1.T + b1.T) @ w2 + b2.
    """
    B, D_in = x.shape
    H = w1.shape[0]

    if B <= block_batch:
        # Single block spanning the whole batch: a full-dim block is legal for
        # any B, so no padding and no ragged handling needed.
        tm = B
    else:
        # Partial blocks: sublane dim must be a multiple of 8.  The ragged
        # tail block (B % tm != 0) is masked by Pallas; no wrapper-side pad.
        tm = max(8, (block_batch // 8) * 8)
    tm = min(tm, B)
    n_tiles = pl.cdiv(B, tm)

    out = pl.pallas_call(
        morality_coach_kernel,
        out_shape=jax.ShapeDtypeStruct((n_tiles, 1, tm), jnp.float32),
        grid=(n_tiles,),
        in_specs=[
            # x: tiled along the batch.
            pl.BlockSpec((tm, D_in), lambda i: (i, 0)),
            # Weights / fc1 bias: constant index maps -> DMA'd once, VMEM resident.
            pl.BlockSpec((H, D_in), lambda i: (0, 0)),
            pl.BlockSpec((H, 1), lambda i: (0, 0)),
            pl.BlockSpec((H, 1), lambda i: (0, 0)),
            # fc2 bias: scalar on the SMEM path (no padded VMEM tile).
            pl.BlockSpec(memory_space=pltpu.MemorySpace.SMEM),
        ],
        # Lane-dense output: one (1, tm) row per batch tile.
        out_specs=pl.BlockSpec((1, 1, tm), lambda i: (i, 0, 0)),
        compiler_params=pltpu.CompilerParams(
            dimension_semantics=("parallel",),
        ),
    )(x, w1, b1, w2, b2)

    # (n_tiles, 1, tm) lane-dense slab -> (B, 1); tail lanes (if any) dropped.
    return out.reshape(-1)[:B].reshape(B, 1)


def init_params(key, input_size, hidden_size=64):
    """Deterministic synthetic parameters (PyTorch-layout shapes)."""
    k1, k2, k3, k4 = jax.random.split(key, 4)
    w1 = jax.random.normal(k1, (hidden_size, input_size), jnp.float32) * 0.1
    b1 = jax.random.normal(k2, (hidden_size, 1), jnp.float32) * 0.1
    w2 = jax.random.normal(k3, (hidden_size, 1), jnp.float32) * 0.1
    b2 = jax.random.normal(k4, (1, 1), jnp.float32) * 0.1
    return w1, b1, w2, b2


def _reference(x, w1, b1, w2, b2):
    hi = jax.lax.Precision.HIGHEST
    h = jnp.maximum(jnp.dot(x, w1.T, precision=hi) + b1.reshape(1, -1), 0.0)
    return jnp.dot(h, w2, precision=hi) + b2.reshape(1, 1)


if __name__ == "__main__":
    key = jax.random.PRNGKey(0)
    kx, kp, kx2 = jax.random.split(key, 3)

    batch = 8
    input_size = 32
    hidden_size = 64

    x = jax.random.normal(kx, (batch, input_size), jnp.float32)
    w1, b1, w2, b2 = init_params(kp, input_size, hidden_size)

    out = morality_coach_forward(x, w1, b1, w2, b2)
    out = jax.block_until_ready(out)
    ref = _reference(x, w1, b1, w2, b2)
    assert out.shape == (batch, 1)
    assert jnp.allclose(out, ref, atol=1e-5, rtol=1e-5)

    # Also exercise the multi-tile + ragged-tail path (B not a tile multiple).
    x2 = jax.random.normal(kx2, (300, input_size), jnp.float32)
    out2 = jax.block_until_ready(
        morality_coach_forward(x2, w1, b1, w2, b2, block_batch=128))
    ref2 = _reference(x2, w1, b1, w2, b2)
    assert out2.shape == (300, 1)
    assert jnp.allclose(out2, ref2, atol=1e-5, rtol=1e-5)

    print("KERNEL_OK")
</pallas_src>

<mosaic_0001>
module attributes {stable_mosaic.version = 11 : i64} {
  func.func @morality_coach_kernel(%arg0: i32, %arg1: memref<8x32xf32, #tpu.memory_space<vmem>>, %arg2: memref<64x32xf32, #tpu.memory_space<vmem>>, %arg3: memref<64x1xf32, #tpu.memory_space<vmem>>, %arg4: memref<64x1xf32, #tpu.memory_space<vmem>>, %arg5: memref<1x1xf32, #tpu.memory_space<smem>>, %arg6: memref<1x1x8xf32, #tpu.memory_space<vmem>>) attributes {dimension_semantics = [#tpu.dimension_semantics<parallel>], iteration_bounds = array<i64: 1>, scalar_prefetch = 0 : i64, scratch_operands = 0 : i64, tpu.core_type = #tpu.core_type<tc>, window_params = [{transform_indices = @transform_0, window_bounds = array<i64: 8, 32>}, {pipeline_mode = #tpu.pipeline_mode<synchronous>, transform_indices = @transform_1, window_bounds = array<i64: 64, 32>}, {pipeline_mode = #tpu.pipeline_mode<synchronous>, transform_indices = @transform_2, window_bounds = array<i64: 64, 1>}, {pipeline_mode = #tpu.pipeline_mode<synchronous>, transform_indices = @transform_3, window_bounds = array<i64: 64, 1>}, {transform_indices = @transform_4, window_bounds = array<i64: 1, 1>}, {transform_indices = @transform_5, window_bounds = array<i64: 1, 1, 8>}]} {
    %c0 = arith.constant 0 : index
    %c0_0 = arith.constant 0 : index
    %0 = vector.load %arg2[%c0, %c0_0] : memref<64x32xf32, #tpu.memory_space<vmem>>, vector<64x32xf32>
    %c0_1 = arith.constant 0 : index
    %c0_2 = arith.constant 0 : index
    %1 = vector.load %arg1[%c0_1, %c0_2] : memref<8x32xf32, #tpu.memory_space<vmem>>, vector<8x32xf32>
    %cst = arith.constant dense<0.000000e+00> : vector<64x8xf32>
    %2 = tpu.matmul %0, %1, %cst {dimension_numbers = #tpu.dot_dimension_numbers<[1], [1], [0], [0], [0, 0, 1, 0], [], []>, precision = #tpu.contract_precision<fp32>} : vector<64x32xf32>, vector<8x32xf32>, vector<64x8xf32> -> vector<64x8xf32>
    %c0_3 = arith.constant 0 : index
    %c0_4 = arith.constant 0 : index
    %3 = vector.load %arg3[%c0_3, %c0_4] : memref<64x1xf32, #tpu.memory_space<vmem>>, vector<64x1xf32>
    %4 = vector.broadcast %3 : vector<64x1xf32> to vector<64x8xf32>
    %5 = arith.addf %2, %4 : vector<64x8xf32>
    %cst_5 = arith.constant 0.000000e+00 : f32
    %6 = vector.broadcast %cst_5 : f32 to vector<64x8xf32>
    %7 = arith.maximumf %5, %6 : vector<64x8xf32>
    %c0_6 = arith.constant 0 : index
    %c0_7 = arith.constant 0 : index
    %8 = vector.load %arg4[%c0_6, %c0_7] : memref<64x1xf32, #tpu.memory_space<vmem>>, vector<64x1xf32>
    %9 = vector.broadcast %8 : vector<64x1xf32> to vector<64x8xf32>
    %10 = arith.mulf %7, %9 : vector<64x8xf32>
    %cst_8 = arith.constant dense<0.000000e+00> : vector<8xf32>
    %11 = vector.multi_reduction <add>, %10, %cst_8 [0] : vector<64x8xf32> to vector<8xf32>
    %12 = vector.shape_cast %11 : vector<8xf32> to vector<1x8xf32>
    %c0_9 = arith.constant 0 : index
    %c0_10 = arith.constant 0 : index
    %13 = memref.load %arg5[%c0_9, %c0_10] : memref<1x1xf32, #tpu.memory_space<smem>>
    %14 = vector.broadcast %13 : f32 to vector<1x8xf32>
    %15 = arith.addf %12, %14 : vector<1x8xf32>
    %16 = vector.shape_cast %15 : vector<1x8xf32> to vector<1x1x8xf32>
    %c0_11 = arith.constant 0 : index
    %c0_12 = arith.constant 0 : index
    %c0_13 = arith.constant 0 : index
    %17 = vector.load %arg6[%c0_11, %c0_12, %c0_13] : memref<1x1x8xf32, #tpu.memory_space<vmem>>, vector<1x1x8xf32>
    tpu.vector_store %arg6[%c0_11, %c0_12, %c0_13], %16 {strides = array<i32>} : memref<1x1x8xf32, #tpu.memory_space<vmem>>, vector<1x1x8xf32>,
    return
  }
  func.func @transform_0(%arg0: i32) -> (i32, i32) {
    %c0_i32 = arith.constant 0 : i32
    %c0_i32_0 = arith.constant 0 : i32
    return %arg0, %c0_i32 : i32, i32
  }
  func.func @transform_1(%arg0: i32) -> (i32, i32) {
    %c0_i32 = arith.constant 0 : i32
    %c0_i32_0 = arith.constant 0 : i32
    %c0_i32_1 = arith.constant 0 : i32
    return %c0_i32, %c0_i32_0 : i32, i32
  }
  func.func @transform_2(%arg0: i32) -> (i32, i32) {
    %c0_i32 = arith.constant 0 : i32
    %c0_i32_0 = arith.constant 0 : i32
    %c0_i32_1 = arith.constant 0 : i32
    return %c0_i32, %c0_i32_0 : i32, i32
  }
  func.func @transform_3(%arg0: i32) -> (i32, i32) {
    %c0_i32 = arith.constant 0 : i32
    %c0_i32_0 = arith.constant 0 : i32
    %c0_i32_1 = arith.constant 0 : i32
    return %c0_i32, %c0_i32_0 : i32, i32
  }
  func.func @transform_4(%arg0: i32) -> (i32, i32) {
    %c0_i32 = arith.constant 0 : i32
    %c0_i32_0 = arith.constant 0 : i32
    %c0_i32_1 = arith.constant 0 : i32
    return %c0_i32, %c0_i32_0 : i32, i32
  }
  func.func @transform_5(%arg0: i32) -> (i32, i32, i32) {
    %c0_i32 = arith.constant 0 : i32
    %c0_i32_0 = arith.constant 0 : i32
    %c0_i32_1 = arith.constant 0 : i32
    return %arg0, %c0_i32, %c0_i32_0 : i32, i32, i32
  }
}

</mosaic_0001>

<bundles_post_ra>
// kernel: tpu_custom_call.1
= control target key start
LH: loop header
LB: loop body
LE: loop exit
PB: predicated region body
PF: predicated region fallthrough
CT: control target
= control target key end

     0   :  { %vm79_vm0 = vcmask 261120   ;;  %v610_v7 = vmov 0   ;;  %s852_s0 = inlined_call_operand.vmem [shape: f32[8,32], index: 0, kind: input, shape index: {}]   ;;  %s853_s1 = inlined_call_operand.vmem [shape: f32[64,32], index: 1, kind: input, shape index: {}]   ;;  %s854_s2 = inlined_call_operand.vmem [shape: f32[64,1], index: 2, kind: input, shape index: {}]   ;;  %s855_s3 = inlined_call_operand.vmem [shape: f32[64,1], index: 3, kind: input, shape index: {}]   ;;  %s856_s4 = inlined_call_operand.<no memory space> [shape: f32[1,1], index: 4, kind: input, shape index: {}]   ;;  %s857_s5 = inlined_call_operand.hbm [shape: f32[1,1,8], index: 5, kind: output, shape index: {}]  }
   0x1   :  { %v30_v0 = vld [vmem:[%s852_s0] sm:$0xff]  ;;  %v27_v2 = vld [vmem:[%s853_s1 + $0x28] sm:$0xff]  ;;  %581 = vset.pattern.permute.xlu0 %v610_v7  ;;  %582 = vset.pattern.permute.xlu1 %v610_v7  ;;  %v28_v13 = vld [vmem:[%s853_s1 + $0x30] sm:$0xff] }
   0x2   :  { %v26_v1 = vld [vmem:[%s853_s1 + $0x20] sm:$0xff]  ;;  %v105_v3 = vsel %vm79_vm0, %v30_v0, 0  ;;  %v96_v5 = vsel %vm79_vm0, %v27_v2, 0  ;;  %v23_v14 = vld [vmem:[%s853_s1 + $0x8] sm:$0xff]  ;;  %583 = vset.pattern.permute.xlu2 %v610_v7  ;;  %v33_v20 = vld [vmem:[%s854_s2 + $0x10] sm:$0xff] }
   0x3   :  { %v93_v4 = vsel %vm79_vm0, %v26_v1, 0  ;;  %v22_v6 = vld [vmem:[%s853_s1] sm:$0xff]  ;;  %v122_v9 = vand.u32 4294901760, %v105_v3  ;;  %v662_v11 = vand.u32 4294901760, %v96_v5  ;;  %v84_v16 = vsel %vm79_vm0, %v23_v14, 0  ;;  %v24_v21 = vld [vmem:[%s853_s1 + $0x10] sm:$0xff] }
   0x4   :  { %v31_v8 = vld [vmem:[%s854_s2] sm:$0xff]  ;;  %v660_v10 = vand.u32 4294901760, %v93_v4  ;;  %v81_v12 = vsel %vm79_vm0, %v22_v6, 0 }
   0x5   :  { %41 = vperm.xlu0 %581, %v31_v8   ;;  %v671_v15 = vand.u32 4294901760, %v81_v12  ;;  %577 = vmatpush.xpose.msra.mxu2 %v122_v9  ;;  %v205_v18 = vsub.f32 %v105_v3, %v122_v9  ;;  %v678_v19 = vsub.f32 %v96_v5, %v662_v11 }
   0x6   :  { %v675_v17 = vsub.f32 %v93_v4, %v660_v10  ;;  %123 = vmatpush.xpose.msra.mxu0 %v122_v9 }
   0x7   :  { %11 = vsyncpa [#allocation4], 0  ;;  %v687_v22 = vsub.f32 %v81_v12, %v671_v15  ;;  %v99_v23 = vsel %vm79_vm0, %v28_v13, 0  ;;  %v690_v24 = vand.u32 4294901760, %v84_v16  ;;  %51 = vperm.xlu1 %582, %v33_v20   ;;  %v206_v26 = vand.u32 4294901760, %v205_v18  ;;  %v32_v29 = vld [vmem:[%s854_s2 + $0x8] sm:$0xff] }
   0x8   :  { %v158_v25 = vand.u32 4294901760, %v675_v17  ;;  %v87_v30 = vsel %vm79_vm0, %v24_v21, 0  ;;  %v166_v33 = vand.u32 4294901760, %v678_v19  ;;  %v705_v34 = vand.u32 4294901760, %v99_v23  ;;  %v29_v39 = vld [vmem:[%s853_s1 + $0x38] sm:$0xff]  ;;  %v37_v49 = vld [vmem:[%s854_s2 + $0x30] sm:$0xff] }
   0x9   :  { %260 = vmatpush.xpose.msrb.mxu2 %v205_v18  ;;  %v126_v27 = vand.u32 4294901760, %v687_v22  ;;  %v695_v28 = vsub.f32 %v84_v16, %v690_v24  ;;  %v207_v32 = vsub.f32 %v205_v18, %v206_v26  ;;  %v714_v40 = vand.u32 4294901760, %v87_v30  ;;  %v34_v44 = vld [vmem:[%s854_s2 + $0x18] sm:$0xff]  ;;  %v35_v59 = vld [vmem:[%s854_s2 + $0x20] sm:$0xff]  ;;  %v36_v4 = vld [vmem:[%s854_s2 + $0x28] sm:$0xff]  ;;  %s611_s15 = smov [#allocation3]  }
   0xa   :  { %v159_v31 = vsub.f32 %v675_v17, %v158_v25  ;;  %386 = vmatpush.xpose.msrb.mxu0 %v206_v26  ;;  %v167_v42 = vsub.f32 %v678_v19, %v166_v33  ;;  %v720_v43 = vsub.f32 %v99_v23, %v705_v34  ;;  %v25_v45 = vld [vmem:[%s853_s1 + $0x18] sm:$0xff]  ;;  %v102_v46 = vsel %vm79_vm0, %v29_v39, 0  ;;  %61 = vperm.xlu2 %583, %v35_v59   ;;  %v479_v8 = vld [vmem:[%s855_s3 + $0x8] sm:$0xff]  ;;  %v480_v12 = vld [vmem:[%s855_s3 + $0x10] sm:$0xff]  ;;  %s566_s16 = sshll.u32 %s611_s15, 4  ;;  %s568_s19 = sshll.u32 %s857_s5, 4  ;;  %s567_s16 = int_to_ptr.vmem [resolvable:$true] %s566_s16  ;;  %s569_s19 = int_to_ptr.hbm [resolvable:$true] %s568_s19 }
   0xb   :  { %v127_v35 = vsub.f32 %v687_v22, %v126_v27  ;;  %v208_v37 = vand.u32 4294901760, %v207_v32  ;;  %v134_v38 = vand.u32 4294901760, %v695_v28  ;;  %v733_v48 = vsub.f32 %v87_v30, %v714_v40  ;;  %v38_v60 = vld [vmem:[%s854_s2 + $0x38] sm:$0xff]  ;;  %v483_v14 = vld [vmem:[%s855_s3 + $0x28] sm:$0xff]  ;;  %v484_v18 = vld [vmem:[%s855_s3 + $0x30] sm:$0xff] }
   0xc   :  { %v160_v36 = vand.u32 4294901760, %v159_v31  ;;  %v90_v50 = vsel %vm79_vm0, %v25_v45, 0  ;;  %v168_v51 = vand.u32 4294901760, %v167_v42  ;;  %v174_v52 = vand.u32 4294901760, %v720_v43  ;;  %v485_v13 = vld [vmem:[%s855_s3 + $0x38] sm:$0xff] }
   0xd   :  { %46 = vperm.xlu0 %581, %v32_v29   ;;  %v128_v41 = vand.u32 4294901760, %v127_v35  ;;  %578 = vmatpush.xpose.msra.mxu3 %v208_v37  ;;  %v135_v47 = vsub.f32 %v695_v28, %v134_v38  ;;  %v742_v53 = vand.u32 4294901760, %v102_v46  ;;  %v142_v55 = vand.u32 4294901760, %v733_v48  ;;  %v481_v16 = vld [vmem:[%s855_s3 + $0x18] sm:$0xff] }
   0xe   :  { %161 = vmatmul.f32.vlgmr.msra.gmra.mxu2 %v160_v36  ;;  %209 = vmatpush.xpose.msra.mxu1 %v208_v37  ;;  %v148_v56 = vand.u32 4294901760, %v90_v50  ;;  %v175_v57 = vsub.f32 %v720_v43, %v174_v52  ;;  %vm534_vm1 = vcmask 64512   ;;  %vm559_vm2 = vcmask 57344  }
   0xf   :  { %129 = vmatmul.f32.vlgmr.msra.gmra.mxu0 %v128_v41  ;;  %56 = vperm.xlu1 %582, %v34_v44   ;;  %v136_v54 = vand.u32 4294901760, %v135_v47  ;;  %v749_v58 = vsub.f32 %v102_v46, %v742_v53  ;;  %v143_v61 = vsub.f32 %v733_v48, %v142_v55 }
  0x10   :  { %227 = vmatmul.f32.vlgmr.msra.gmra.mxu3 %v660_v10  ;;  %v149_v62 = vsub.f32 %v90_v50, %v148_v56  ;;  %v176_v63 = vand.u32 4294901760, %v175_v57 }
  0x11   :  { %318 = vmatpush.xpose.msrb.mxu3 %v122_v9  ;;  %211 = vmatmul.f32.vlgmr.msra.gmra.mxu1 %v671_v15  ;;  %v182_v0 = vand.u32 4294901760, %v749_v58  ;;  %v144_v1 = vand.u32 4294901760, %v143_v61 }
  0x12   :  { %436 = vmatpush.xpose.msrb.mxu1 %v122_v9  ;;  %v150_v2 = vand.u32 4294901760, %v149_v62  ;;  %66 = vperm.xlu2 %583, %v36_v4   ;;  %v482_v9 = vld [vmem:[%s855_s3 + $0x20] sm:$0xff] }
  0x13   :  { %v183_v3 = vsub.f32 %v749_v58, %v182_v0 }
  0x14   :  { %v151_v5 = vsub.f32 %v149_v62, %v150_v2 }
  0x15   :  { %71 = vperm.xlu0 %581, %v37_v49   ;;  %v184_v6 = vand.u32 4294901760, %v183_v3 }
  0x16   :  { %169 = vmatmul.f32.gmra.mxu2 %v168_v51  ;;  %v152_v7 = vand.u32 4294901760, %v151_v5 }
  0x17   :  { %137 = vmatmul.f32.gmra.mxu0 %v136_v54  ;;  %76 = vperm.xlu1 %582, %v38_v60  }
  0x18   :  { %231 = vmatmul.f32.gmra.mxu3 %v662_v11 }
  0x19   :  { %215 = vmatmul.f32.gmra.mxu1 %v690_v24 }
  0x1d   :  { %493 = vperm.xlu0 %581, %v479_v8  }
  0x1e   :  { %177 = vmatmul.f32.gmra.mxu2 %v176_v63 }
  0x1f   :  { %145 = vmatmul.f32.gmra.mxu0 %v144_v1  ;;  %498 = vperm.xlu1 %582, %v480_v12  }
  0x20   :  { %235 = vmatmul.f32.gmra.mxu3 %v705_v34 }
  0x21   :  { %219 = vmatmul.f32.gmra.mxu1 %v714_v40 }
  0x25   :  { %508 = vperm.xlu0 %581, %v482_v9  }
  0x26   :  { %185 = vmatmul.f32.gmra.mxu2 %v184_v6 }
  0x27   :  { %153 = vmatmul.f32.gmra.mxu0 %v152_v7  ;;  %513 = vperm.xlu1 %582, %v483_v14  }
  0x28   :  { %239 = vmatmul.f32.gmra.mxu3 %v742_v53 }
  0x29   :  { %223 = vmatmul.f32.gmra.mxu1 %v148_v56 }
  0x2d   :  { %523 = vperm.xlu0 %581, %v485_v13  }
  0x2e   :  { %263 = vmatmul.f32.vlgmr.msrb.gmra.mxu2 %v687_v22 }
  0x2f   :  { %388 = vmatmul.f32.vlgmr.msrb.gmra.mxu0 %v671_v15 }
  0x30   :  { %322 = vmatmul.f32.vlgmr.msrb.gmra.mxu3 %v126_v27 }
  0x31   :  { %438 = vmatmul.f32.vlgmr.msrb.gmra.mxu1 %v671_v15  ;;  %v478_v15 = vld [vmem:[%s855_s3] sm:$0xff] }
  0x32   :  { %488 = vperm.xlu2 %583, %v478_v15  }
  0x36   :  { %268 = vmatmul.f32.gmra.mxu2 %v695_v28 }
  0x37   :  { %392 = vmatmul.f32.gmra.mxu0 %v690_v24 }
  0x38   :  { %328 = vmatmul.f32.gmra.mxu3 %v134_v38 }
  0x39   :  { %442 = vmatmul.f32.gmra.mxu1 %v690_v24 }
  0x3a   :  { %503 = vperm.xlu2 %583, %v481_v16  }
  0x3e   :  { %273 = vmatmul.f32.gmra.mxu2 %v733_v48 }
  0x3f   :  { %396 = vmatmul.f32.gmra.mxu0 %v714_v40 }
  0x40   :  { %334 = vmatmul.f32.gmra.mxu3 %v142_v55 }
  0x41   :  { %446 = vmatmul.f32.gmra.mxu1 %v714_v40 }
  0x42   :  { %518 = vperm.xlu2 %583, %v484_v18  }
  0x46   :  { %278 = vmatmul.f32.gmra.mxu2 %v149_v62 }
  0x47   :  { %400 = vmatmul.f32.gmra.mxu0 %v148_v56 }
  0x48   :  { %340 = vmatmul.f32.gmra.mxu3 %v150_v2 }
  0x49   :  { %450 = vmatmul.f32.gmra.mxu1 %v148_v56 }
  0x4e   :  { %283 = vmatmul.f32.gmra.mxu2 %v675_v17 }
  0x4f   :  { %404 = vmatmul.f32.gmra.mxu0 %v660_v10 }
  0x50   :  { %346 = vmatmul.f32.gmra.mxu3 %v158_v25 }
  0x51   :  { %454 = vmatmul.f32.gmra.mxu1 %v660_v10 }
  0x56   :  { %288 = vmatmul.f32.gmra.mxu2 %v678_v19 }
  0x57   :  { %408 = vmatmul.f32.gmra.mxu0 %v662_v11 }
  0x58   :  { %352 = vmatmul.f32.gmra.mxu3 %v166_v33 }
  0x59   :  { %458 = vmatmul.f32.gmra.mxu1 %v662_v11 }
  0x5e   :  { %293 = vmatmul.f32.gmra.mxu2 %v720_v43 }
  0x5f   :  { %412 = vmatmul.f32.gmra.mxu0 %v705_v34 }
  0x60   :  { %358 = vmatmul.f32.gmra.mxu3 %v174_v52 }
  0x61   :  { %462 = vmatmul.f32.gmra.mxu1 %v705_v34 }
  0x64   :  { %v62_v17 = vpop.permute.xlu2 %61 }
  0x66   :  { %298 = vmatmul.f32.gmra.mxu2 %v749_v58 }
  0x67   :  { %416 = vmatmul.f32.gmra.mxu0 %v742_v53 }
  0x68   :  { %364 = vmatmul.f32.gmra.mxu3 %v182_v0 }
  0x69   :  { %466 = vmatmul.f32.gmra.mxu1 %v742_v53 }
  0x6c   :  { %v67_v28 = vpop.permute.xlu2 %66 }
  0x77   :  { %v42_v10 = vpop.permute.xlu0 %41 }
  0x79   :  { %v52_v51 = vpop.permute.xlu1 %51 }
  0x7f   :  { %v47_v26 = vpop.permute.xlu0 %46 }
  0x81   :  { %v57_v63 = vpop.permute.xlu1 %56 }
  0x87   :  { %v72_v35 = vpop.permute.xlu0 %71 }
  0x89   :  { %v77_v18 = vpop.permute.xlu1 %76 }
  0x8c   :  { %v130_v19 = vpop.f32.mrf.mxu0 }
  0x8d   :  { %v131_v11 = vadd.f32 %v130_v19, %v42_v10 }
  0x8e   :  { %v212_v20 = vpop.f32.mrf.mxu1 }
  0x8f   :  { %v213_v21 = vadd.f32 %v212_v20, %v131_v11  ;;  %v489_v20 = vpop.permute.xlu2 %488 }
  0x91   :  { %v162_v22 = vpop.f32.mrf.mxu2 }
  0x92   :  { %v163_v23 = vadd.f32 %v162_v22, %v62_v17 }
  0x93   :  { %v228_v24 = vpop.f32.mrf.mxu3 }
  0x94   :  { %v823_v25 = vadd.f32 %v228_v24, %v163_v23  ;;  %v138_v27 = vpop.f32.mrf.mxu0 }
  0x95   :  { %v139_v52 = vadd.f32 %v138_v27, %v47_v26 }
  0x96   :  { %v216_v29 = vpop.f32.mrf.mxu1 }
  0x97   :  { %v217_v56 = vadd.f32 %v216_v29, %v139_v52 }
  0x99   :  { %v170_v30 = vpop.f32.mrf.mxu2 }
  0x9a   :  { %v171_v31 = vadd.f32 %v170_v30, %v67_v28  ;;  %v494_v30 = vpop.permute.xlu0 %493 }
  0x9b   :  { %v232_v32 = vpop.f32.mrf.mxu3 }
  0x9c   :  { %v825_v33 = vadd.f32 %v232_v32, %v171_v31  ;;  %v146_v34 = vpop.f32.mrf.mxu0 }
  0x9d   :  { %v147_v54 = vadd.f32 %v146_v34, %v52_v51 }
  0x9e   :  { %v220_v36 = vpop.f32.mrf.mxu1 }
  0x9f   :  { %v221_v60 = vadd.f32 %v220_v36, %v147_v54 }
  0xa1   :  { %v178_v37 = vpop.f32.mrf.mxu2 }
  0xa2   :  { %v179_v38 = vadd.f32 %v178_v37, %v72_v35  ;;  %v499_v35 = vpop.permute.xlu1 %498 }
  0xa3   :  { %v236_v39 = vpop.f32.mrf.mxu3 }
  0xa4   :  { %v827_v40 = vadd.f32 %v236_v39, %v179_v38  ;;  %v154_v41 = vpop.f32.mrf.mxu0 }
  0xa5   :  { %v155_v2 = vadd.f32 %v154_v41, %v57_v63  ;;  %v504_v41 = vpop.permute.xlu2 %503 }
  0xa6   :  { %v224_v42 = vpop.f32.mrf.mxu1 }
  0xa7   :  { %v225_v9 = vadd.f32 %v224_v42, %v155_v2 }
  0xa9   :  { %v829_v43 = vpop.f32.mrf.mxu2 }
  0xab   :  { %v831_v44 = vpop.f32.mrf.mxu3 }
  0xac   :  { %v389_v45 = vpop.f32.mrf.mxu0 }
  0xae   :  { %v439_v46 = vpop.f32.mrf.mxu1 }
  0xb1   :  { %v264_v47 = vpop.f32.mrf.mxu2 }
  0xb2   :  { %v265_v61 = vadd.f32 %v264_v47, %v213_v21 }
  0xb3   :  { %v323_v48 = vpop.f32.mrf.mxu3 }
  0xb4   :  { %v393_v49 = vpop.f32.mrf.mxu0  ;;  %v324_v4 = vadd.f32 %v323_v48, %v265_v61 }
  0xb6   :  { %v443_v50 = vpop.f32.mrf.mxu1  ;;  %v390_v12 = vadd.f32 %v389_v45, %v324_v4 }
  0xb8   :  { %v440_v17 = vadd.f32 %v439_v46, %v390_v12 }
  0xb9   :  { %v269_v53 = vpop.f32.mrf.mxu2 }
  0xba   :  { %v270_v58 = vadd.f32 %v269_v53, %v217_v56  ;;  %v470_v26 = vmax.f32 %v440_v17, 0.0  ;;  %v509_v56 = vpop.permute.xlu0 %508 }
  0xbb   :  { %v329_v55 = vpop.f32.mrf.mxu3 }
  0xbc   :  { %v397_v57 = vpop.f32.mrf.mxu0  ;;  %v330_v1 = vadd.f32 %v329_v55, %v270_v58  ;;  %v526_v37 = vmul.f32 %v489_v20, %v470_v26 }
  0xbe   :  { %v447_v59 = vpop.f32.mrf.mxu1  ;;  %v394_v7 = vadd.f32 %v393_v49, %v330_v1  ;;  %v535_v48 = vsel %vm534_vm1, %v526_v37, 0.0 }
  0xc0   :  { %v444_v16 = vadd.f32 %v443_v50, %v394_v7 }
  0xc1   :  { %v274_v62 = vpop.f32.mrf.mxu2 }
  0xc2   :  { %v275_v0 = vadd.f32 %v274_v62, %v221_v60  ;;  %v471_v22 = vmax.f32 %v444_v16, 0.0 }
  0xc3   :  { %v335_v3 = vpop.f32.mrf.mxu3 }
  0xc4   :  { %v336_v5 = vadd.f32 %v335_v3, %v275_v0  ;;  %v401_v6 = vpop.f32.mrf.mxu0  ;;  %v527_v32 = vmul.f32 %v494_v30, %v471_v22 }
  0xc6   :  { %v451_v8 = vpop.f32.mrf.mxu1  ;;  %v398_v13 = vadd.f32 %v397_v57, %v336_v5  ;;  %v536_v42 = vsel %vm534_vm1, %v527_v32, 0.0 }
  0xc7   :  { %v537_v51 = vadd.f32 %v536_v42, %v535_v48 }
  0xc8   :  { %v448_v19 = vadd.f32 %v447_v59, %v398_v13 }
  0xc9   :  { %v279_v14 = vpop.f32.mrf.mxu2 }
  0xca   :  { %v280_v15 = vadd.f32 %v279_v14, %v225_v9  ;;  %v472_v27 = vmax.f32 %v448_v19, 0.0 }
  0xcb   :  { %v341_v10 = vpop.f32.mrf.mxu3 }
  0xcc   :  { %v342_v11 = vadd.f32 %v341_v10, %v280_v15  ;;  %v405_v21 = vpop.f32.mrf.mxu0  ;;  %v528_v38 = vmul.f32 %v499_v35, %v472_v27 }
  0xce   :  { %v402_v23 = vadd.f32 %v401_v6, %v342_v11  ;;  %v455_v24 = vpop.f32.mrf.mxu1  ;;  %v538_v49 = vsel %vm534_vm1, %v528_v38, 0.0  ;;  %v187_v6 = vadd.f32 %v829_v43, %v77_v18  ;;  %v519_v11 = vpop.permute.xlu2 %518  ;;  %v557_v38 = vstv %s856_s4 }
  0xcf   :  { %v539_v57 = vadd.f32 %v538_v49, %v537_v51 }
  0xd0   :  { %v452_v28 = vadd.f32 %v451_v8, %v402_v23  ;;  %v241_v15 = vadd.f32 %v831_v44, %v187_v6 }
  0xd1   :  { %v284_v29 = vpop.f32.mrf.mxu2 }
  0xd2   :  { %v285_v31 = vadd.f32 %v284_v29, %v823_v25  ;;  %v473_v34 = vmax.f32 %v452_v28, 0.0  ;;  %v524_v29 = vpop.permute.xlu0 %523 }
  0xd3   :  { %v347_v36 = vpop.f32.mrf.mxu3 }
  0xd4   :  { %v348_v39 = vadd.f32 %v347_v36, %v285_v31  ;;  %v529_v45 = vmul.f32 %v504_v41, %v473_v34  ;;  %v409_v47 = vpop.f32.mrf.mxu0 }
  0xd6   :  { %v406_v46 = vadd.f32 %v405_v21, %v348_v39  ;;  %v459_v53 = vpop.f32.mrf.mxu1  ;;  %v540_v54 = vsel %vm534_vm1, %v529_v45, 0.0 }
  0xd7   :  { %v541_v61 = vadd.f32 %v540_v54, %v539_v57 }
  0xd8   :  { %v456_v50 = vadd.f32 %v455_v24, %v406_v46 }
  0xd9   :  { %v289_v25 = vpop.f32.mrf.mxu2 }
  0xda   :  { %v290_v52 = vadd.f32 %v289_v25, %v825_v33  ;;  %v474_v55 = vmax.f32 %v456_v50, 0.0  ;;  %v514_v33 = vpop.permute.xlu1 %513 }
  0xdb   :  { %v353_v58 = vpop.f32.mrf.mxu3 }
  0xdc   :  { %v530_v59 = vmul.f32 %v509_v56, %v474_v55  ;;  %v354_v60 = vadd.f32 %v353_v58, %v290_v52  ;;  %v413_v4 = vpop.f32.mrf.mxu0 }
  0xde   :  { %v542_v62 = vsel %vm534_vm1, %v530_v59, 0.0  ;;  %v410_v63 = vadd.f32 %v409_v47, %v354_v60  ;;  %v463_v8 = vpop.f32.mrf.mxu1 }
  0xdf   :  { %v543_v0 = vadd.f32 %v542_v62, %v541_v61 }
  0xe0   :  { %v460_v1 = vadd.f32 %v459_v53, %v410_v63 }
  0xe1   :  { %v294_v2 = vpop.f32.mrf.mxu2 }
  0xe2   :  { %v295_v3 = vadd.f32 %v294_v2, %v827_v40  ;;  %v475_v5 = vmax.f32 %v460_v1, 0.0 }
  0xe3   :  { %v359_v7 = vpop.f32.mrf.mxu3 }
  0xe4   :  { %v531_v9 = vmul.f32 %v514_v33, %v475_v5  ;;  %v360_v12 = vadd.f32 %v359_v7, %v295_v3  ;;  %v417_v21 = vpop.f32.mrf.mxu0 }
  0xe6   :  { %v544_v13 = vsel %vm534_vm1, %v531_v9, 0.0  ;;  %v414_v14 = vadd.f32 %v413_v4, %v360_v12  ;;  %v467_v43 = vpop.f32.mrf.mxu1 }
  0xe7   :  { %v545_v16 = vadd.f32 %v544_v13, %v543_v0 }
  0xe8   :  { %v464_v10 = vadd.f32 %v463_v8, %v414_v14 }
  0xe9   :  { %v299_v17 = vpop.f32.mrf.mxu2 }
  0xea   :  { %v300_v19 = vadd.f32 %v299_v17, %v241_v15  ;;  %v476_v40 = vmax.f32 %v464_v10, 0.0 }
  0xeb   :  { %v365_v20 = vpop.f32.mrf.mxu3 }
  0xec   :  { %v532_v22 = vmul.f32 %v519_v11, %v476_v40  ;;  %v366_v23 = vadd.f32 %v365_v20, %v300_v19 }
  0xee   :  { %v546_v18 = vsel %vm534_vm1, %v532_v22, 0.0  ;;  %v418_v24 = vadd.f32 %v417_v21, %v366_v23 }
  0xef   :  { %v547_v26 = vadd.f32 %v546_v18, %v545_v16 }
  0xf0   :  { %v468_v27 = vadd.f32 %v467_v43, %v418_v24 }
  0xf2   :  { %v477_v28 = vmax.f32 %v468_v27, 0.0 }
  0xf4   :  { %v533_v30 = vmul.f32 %v524_v29, %v477_v28 }
  0xf6   :  { %v548_v44 = vsel %vm534_vm1, %v533_v30, 0.0 }
  0xf7   :  { %v549_v31 = vadd.f32 %v548_v44, %v547_v26 }
  0xf9   :  { %v550_v32 = vrot.slane %v549_v31, 4 }
  0xfb   :  { %v551_v34 = vadd.f32 %v550_v32, %v549_v31 }
  0xfd   :  { %v552_v35 = vrot.slane %v551_v34, 2 }
  0xff   :  { %v553_v36 = vadd.f32 %v552_v35, %v551_v34 }
 0x101   :  { %v554_v37 = vrot.slane %v553_v36, 1 }
 0x103   :  { %v555_v39 = vadd.f32 %v554_v37, %v553_v36 }
 0x105   :  { %v558_v41 = vadd.f32 %v557_v38, %v555_v39 }
 0x107   :  { %560 = vst.msk [vmem:[#allocation3] sm:$0x1] %vm559_vm2, %v558_v41 }
 0x108   :  { %571 = dma.vmem_to_hbm [thread:$0]  %s567_s16, 16, %s569_s19, [#allocation4]  }
 0x109   :  { %608 = dma.done.wait [#allocation4], 16  }
 0x10a   :  { %609 = vsyncadd [#allocation4], 4294967280 }
 0x10b   :  { %576 = vsyncpa [#allocation4], 1 }

</bundles_post_ra>
